<compile_context>
chip_gen: v5e
topology: v5e:2x2
jax: 0.10.0
libtpu: 0.0.40
codegen_flags: <defaults>
</compile_context>

<pallas_src>
import jax
import jax.numpy as jnp
import numpy as np
from jax.experimental import pallas as pl
from jax.experimental.pallas import tpu as pltpu

# ---------------- configuration (shapes implied by the module __init__) ----------------
B = 2                 # batch
L = 8                 # sequence length
IN_PLANES = 32        # in_features
OUT_PLANES = 32       # out_features
KERNEL_SIZE = 1
GROUPS = 1
REDUCTION = 0.0625
HIDDEN = max(int(IN_PLANES * REDUCTION), 16)            # 16

# warehouse cell shape: (num_spatial_cells, cell_out, cell_in, cell_k)
NUM_SPATIAL_CELLS = 8
CELL_OUT, CELL_IN, CELL_K = 16, 16, 1
GROUPS_OUT = OUT_PLANES // CELL_OUT                     # 2
GROUPS_IN = IN_PLANES // CELL_IN // GROUPS              # 2
GROUPS_SPATIAL = KERNEL_SIZE // CELL_K                  # 1
NUM_LOCAL_MIXTURE = GROUPS_OUT * GROUPS_IN * GROUPS_SPATIAL   # 4

KW_PLANES_PER_MIX = NUM_SPATIAL_CELLS + 1               # 9 (last = dropped column)
KW_PLANES = KW_PLANES_PER_MIX * NUM_LOCAL_MIXTURE       # 36
KW_EFF = NUM_SPATIAL_CELLS * NUM_LOCAL_MIXTURE          # 32 kept planes (1152 -> 1024 lanes)
TEMP_VALUE = 0.0      # module default; ==0 -> temperature mixing is the identity
BN_EPS = 1e-5

# aggregation chunking: 128 output lanes (= PLANES_PER_CHUNK kept planes) per step
LANE_CHUNK = 128
PLANES_PER_CHUNK = LANE_CHUNK // OUT_PLANES             # 4
N_CHUNKS = (KW_EFF * OUT_PLANES) // LANE_CHUNK          # 8
assert LANE_CHUNK % OUT_PLANES == 0
assert NUM_SPATIAL_CELLS % PLANES_PER_CHUNK == 0        # a chunk never straddles a mixture
assert (KW_EFF * OUT_PLANES) % LANE_CHUNK == 0


# ----------------------------------- fused Pallas kernel --------------------------------
def _kw_linear_fused_kernel(x_ref, poolmat_ref, fc1s_wt_ref, bn_shift_ref,
                            sh_wt_ref, sh_b_ref, selsum_ref, cells_ref, out_ref):
    f32 = jnp.float32
    x = x_ref[...]                                                          # (B*L, IN) bf16

    # --- Attention MLP: adaptive_avg_pool1d(1) + fc1(·bn_scale) + bn_shift + ReLU + head
    pooled = jnp.dot(poolmat_ref[...], x, preferred_element_type=f32)       # (B, IN)
    h = jnp.dot(pooled, fc1s_wt_ref[...], preferred_element_type=f32)       # (B, H)
    h = jnp.maximum(h + bn_shift_ref[...], 0.0)                             # eval BN + ReLU
    raw = jnp.dot(h, sh_wt_ref[...], preferred_element_type=f32) + sh_b_ref[...]  # (B, KW)

    # --- per-mixture L1 normalisation (denominator DOES include the soon-dropped column);
    #     the divide runs on the EUP via an approximate reciprocal.
    denom = jnp.dot(jnp.abs(raw), selsum_ref[...], preferred_element_type=f32) + 0.001
    inv_denom = pl.reciprocal(denom, approx=True)                           # (B, M)
    # TEMP_VALUE == 0.0 -> temperature mixing is the identity; elided at trace time.

    # --- fused "aggregate warehouse cells + grouped conv1d(K=1)", 128 lanes per chunk:
    #       out[r, o] = sum_k att[b(r), k] * (x[r, :] @ C[k, :, o])
    #     lane index of chunk t, slot j, output o  =  t*128 + j*32 + o  (kept plane k=4t+j).
    #     Attention is lane-replicated with broadcasts (no erep matmul), row-replicated
    #     with sublane broadcasts (no rep matmul); the plane sum is chunk adds + rolls
    #     (no gsum matmul).
    acc = jnp.zeros((B * L, LANE_CHUNK), f32)
    for t in range(N_CHUNKS):                                               # unrolled (8)
        m = (PLANES_PER_CHUNK * t) // NUM_SPATIAL_CELLS                     # chunk's mixture
        p0 = (PLANES_PER_CHUNK * t) % NUM_SPATIAL_CELLS
        inv_m = inv_denom[:, m:m + 1]                                       # (B, 1)
        pieces = []
        for j in range(PLANES_PER_CHUNK):                                   # 4 kept planes
            col = m * KW_PLANES_PER_MIX + p0 + j                            # column in raw
            a = raw[:, col:col + 1] * inv_m                                 # (B, 1)
            pieces.append(jnp.broadcast_to(a, (B, OUT_PLANES)))             # lane-replicate
        att_b = jnp.concatenate(pieces, axis=1)                             # (B, 128)
        att = jnp.concatenate(
            [jnp.broadcast_to(att_b[b:b + 1, :], (L, LANE_CHUNK)) for b in range(B)],
            axis=0)                                                         # (B*L, 128)
        xc = jnp.dot(x, cells_ref[:, t * LANE_CHUNK:(t + 1) * LANE_CHUNK],
                     preferred_element_type=f32)                            # (B*L, 128)
        acc = acc + att * xc

    # fold the PLANES_PER_CHUNK intra-chunk groups (OUT lanes each) onto lanes [0, OUT)
    shift = LANE_CHUNK // 2
    while shift >= OUT_PLANES:                                              # shifts 64, 32
        acc = acc + pltpu.roll(acc, shift=shift, axis=1)
        shift //= 2
    out_ref[...] = acc[:, :OUT_PLANES]                                      # (B*L, OUT)


# ------------------------------------- wrapper ------------------------------------------
def kw_linear_forward(x, params):
    """KWLinear forward; x is (B, L, in_features) -> (B, L, out_features)."""
    b, l, f = x.shape
    assert (b, l, f) == (B, L, IN_PLANES), (b, l, f)
    x2d = x.reshape(b * l, f).astype(jnp.bfloat16)   # row-major no-op reshape + bf16 cast
    y2d = pl.pallas_call(
        _kw_linear_fused_kernel,
        out_shape=jax.ShapeDtypeStruct((b * l, OUT_PLANES), jnp.float32),
    )(x2d, params["poolmat"], params["fc1s_w_t"], params["bn_shift"],
      params["sh_w_t"], params["sh_b"], params["selsum"], params["cells_c2"])
    return y2d.reshape(b, l, OUT_PLANES)


# --------------------------- pure-JAX reference (unfused math) --------------------------
def kw_linear_reference(x, params):
    """Eval-mode reference mirroring the PyTorch KWLinear computation step by step."""
    b, l, _ = x.shape
    with jax.default_matmul_precision("highest"):
        x_ncl = jnp.transpose(x, (0, 2, 1))                        # (B, C_in, L)
        pooled = jnp.mean(x_ncl, axis=-1)                          # (B, C_in)
        h = pooled @ params["fc1_w"].T
        h = jnp.maximum(h * params["bn_scale_vec"] + params["bn_shift_vec"], 0.0)
        raw = h @ params["sh_w"].T + params["sh_b_raw"]            # (B, KW)
        a = raw.reshape(b * NUM_LOCAL_MIXTURE, KW_PLANES_PER_MIX)
        a = a / (jnp.sum(jnp.abs(a), axis=1, keepdims=True) + 0.001)
        kw_att = a[:, :-1]                                         # (B*M, S)
        cells_flat = params["cells"].reshape(NUM_SPATIAL_CELLS, -1)
        agg = kw_att @ cells_flat                                  # (B*M, co*ci*ck)
        agg = agg.reshape(b, GROUPS_SPATIAL, GROUPS_OUT, GROUPS_IN,
                          CELL_OUT, CELL_IN, CELL_K)
        agg = jnp.transpose(agg, (0, 2, 4, 3, 5, 1, 6))            # KWConv1d permute
        w = agg.reshape(b, OUT_PLANES, IN_PLANES)                  # K=1, groups=1
        y = jnp.einsum('boi,bil->bol', w, x_ncl)
        return jnp.transpose(y, (0, 2, 1))                         # (B, L, OUT)


# --------------------------- deterministic parameter init -------------------------------
def init_params(key):
    k1, k2, k3 = jax.random.split(key, 3)
    # kaiming_normal_(mode='fan_out', relu): std = sqrt(2 / fan_out)
    fc1_w = jax.random.normal(k1, (HIDDEN, IN_PLANES), jnp.float32) * jnp.sqrt(2.0 / HIDDEN)
    sh_w = jax.random.normal(k2, (KW_PLANES, HIDDEN), jnp.float32) * jnp.sqrt(2.0 / KW_PLANES)
    sh_b = jnp.zeros((KW_PLANES,), jnp.float32)
    cells = jax.random.normal(
        k3, (NUM_SPATIAL_CELLS, CELL_OUT, CELL_IN, CELL_K), jnp.float32) * 0.02

    # eval-mode BatchNorm1d(HIDDEN): weight=1, bias=0, running_mean=0, running_var=1
    # TODO(synk): training-mode BatchNorm batch statistics are not reproduced.
    bn_w = jnp.ones((HIDDEN,), jnp.float32)
    bn_b = jnp.zeros((HIDDEN,), jnp.float32)
    bn_mean = jnp.zeros((HIDDEN,), jnp.float32)
    bn_var = jnp.ones((HIDDEN,), jnp.float32)
    inv_std = bn_w / jnp.sqrt(bn_var + BN_EPS)
    bn_scale_vec = inv_std                                         # (H,)
    bn_shift_vec = bn_b - bn_mean * inv_std                        # (H,)

    # BN scale folded into fc1 weight columns (kernel operand); shift stays additive.
    fc1s_w_t = (fc1_w * bn_scale_vec[:, None]).T                   # (IN, H)

    # -------- init-time folding of all layout glue into constant operands --------
    # Kept planes only (KW_EFF = 32): the dropped last attention column of every mixture is
    # structurally zero in the aggregation, so it is excluded from the folded cell tensor
    # (it still contributes to the L1 denominator through raw/selsum).
    assert GROUPS_SPATIAL == 1 and CELL_K == 1 and KERNEL_SIZE == 1 and GROUPS == 1
    cells_np = np.asarray(cells)                                   # (S, co, ci, ck)
    cells_tens = np.zeros((KW_EFF, IN_PLANES, OUT_PLANES), np.float32)
    for m in range(NUM_LOCAL_MIXTURE):                             # m = go * GROUPS_IN + gi
        go, gi = m // GROUPS_IN, m % GROUPS_IN
        for p in range(NUM_SPATIAL_CELLS):
            k = m * NUM_SPATIAL_CELLS + p                          # kept-plane index
            cells_tens[k,
                       gi * CELL_IN:(gi + 1) * CELL_IN,
                       go * CELL_OUT:(go + 1) * CELL_OUT] = cells_np[p, :, :, 0].T
    # C2[i, k*OUT + o] = C[k, i, o]   (k-major lane order so the roll reduction folds planes)
    cells_c2 = cells_tens.transpose(1, 0, 2).reshape(IN_PLANES, KW_EFF * OUT_PLANES)

    # pooling (mean over L per batch) and per-mixture |.|-sum matrices (tiny constants)
    poolmat = np.kron(np.eye(B), np.ones((1, L))).astype(np.float32) / float(L)   # (B, B*L)
    selsum = np.kron(np.eye(NUM_LOCAL_MIXTURE),
                     np.ones((KW_PLANES_PER_MIX, 1))).astype(np.float32)          # (KW, M)

    return dict(
        # fused-kernel operands (big ones in bf16; all dots accumulate in f32)
        poolmat=jnp.asarray(poolmat, jnp.bfloat16),
        fc1s_w_t=fc1s_w_t,
        bn_shift=bn_shift_vec.reshape(1, HIDDEN),
        sh_w_t=sh_w.T,
        sh_b=sh_b.reshape(1, KW_PLANES),
        selsum=jnp.asarray(selsum),
        cells_c2=jnp.asarray(cells_c2, jnp.bfloat16),
        # raw parameters (for the pure-JAX reference)
        fc1_w=fc1_w, bn_scale_vec=bn_scale_vec, bn_shift_vec=bn_shift_vec,
        sh_w=sh_w, sh_b_raw=sh_b, cells=cells,
    )


if __name__ == "__main__":
    key = jax.random.PRNGKey(0)
    pkey, xkey = jax.random.split(key)
    params = init_params(pkey)
    x = jax.random.normal(xkey, (B, L, IN_PLANES), jnp.float32)

    out = jax.block_until_ready(kw_linear_forward(x, params))
    assert out.shape == (B, L, OUT_PLANES), out.shape
    assert bool(jnp.all(jnp.isfinite(out)))

    # correctness check vs unfused pure-JAX reference
    # (loose tol: bf16 operands + default MXU precision + approx reciprocal)
    ref = jax.block_until_ready(kw_linear_reference(x, params))
    max_err = float(jnp.max(jnp.abs(out - ref)))
    assert bool(jnp.allclose(out, ref, rtol=5e-2, atol=5e-3)), max_err

    print("KERNEL_OK")
</pallas_src>

<mosaic_0001>
module attributes {stable_mosaic.version = 11 : i64} {
  func.func @_kw_linear_fused_kernel(%arg0: memref<16x32xbf16, #tpu.memory_space<vmem>>, %arg1: memref<2x16xbf16, #tpu.memory_space<vmem>>, %arg2: memref<32x16xf32, #tpu.memory_space<vmem>>, %arg3: memref<1x16xf32, #tpu.memory_space<vmem>>, %arg4: memref<16x36xf32, #tpu.memory_space<vmem>>, %arg5: memref<1x36xf32, #tpu.memory_space<vmem>>, %arg6: memref<36x4xf32, #tpu.memory_space<vmem>>, %arg7: memref<32x1024xbf16, #tpu.memory_space<vmem>>, %arg8: memref<16x32xf32, #tpu.memory_space<vmem>>) attributes {dimension_semantics = [], scalar_prefetch = 0 : i64, scratch_operands = 0 : i64, tpu.core_type = #tpu.core_type<tc>} {
    %c0 = arith.constant 0 : index
    %c0_0 = arith.constant 0 : index
    %0 = vector.load %arg0[%c0, %c0_0] : memref<16x32xbf16, #tpu.memory_space<vmem>>, vector<16x32xbf16>
    %c0_1 = arith.constant 0 : index
    %c0_2 = arith.constant 0 : index
    %1 = vector.load %arg1[%c0_1, %c0_2] : memref<2x16xbf16, #tpu.memory_space<vmem>>, vector<2x16xbf16>
    %cst = arith.constant dense<0.000000e+00> : vector<2x32xf32>
    %2 = tpu.matmul %1, %0, %cst {dimension_numbers = #tpu.dot_dimension_numbers<[1], [0], [0], [1], [0, 0, 1, 1], [], []>} : vector<2x16xbf16>, vector<16x32xbf16>, vector<2x32xf32> -> vector<2x32xf32>
    %c0_3 = arith.constant 0 : index
    %c0_4 = arith.constant 0 : index
    %3 = vector.load %arg2[%c0_3, %c0_4] : memref<32x16xf32, #tpu.memory_space<vmem>>, vector<32x16xf32>
    %cst_5 = arith.constant dense<0.000000e+00> : vector<2x16xf32>
    %4 = tpu.matmul %2, %3, %cst_5 {dimension_numbers = #tpu.dot_dimension_numbers<[1], [0], [0], [1], [0, 0, 1, 1], [], []>} : vector<2x32xf32>, vector<32x16xf32>, vector<2x16xf32> -> vector<2x16xf32>
    %c0_6 = arith.constant 0 : index
    %c0_7 = arith.constant 0 : index
    %5 = vector.load %arg3[%c0_6, %c0_7] : memref<1x16xf32, #tpu.memory_space<vmem>>, vector<1x16xf32>
    %6 = vector.broadcast %5 : vector<1x16xf32> to vector<2x16xf32>
    %7 = arith.addf %4, %6 : vector<2x16xf32>
    %cst_8 = arith.constant 0.000000e+00 : f32
    %8 = vector.broadcast %cst_8 : f32 to vector<2x16xf32>
    %9 = arith.maximumf %7, %8 : vector<2x16xf32>
    %c0_9 = arith.constant 0 : index
    %c0_10 = arith.constant 0 : index
    %10 = vector.load %arg4[%c0_9, %c0_10] : memref<16x36xf32, #tpu.memory_space<vmem>>, vector<16x36xf32>
    %cst_11 = arith.constant dense<0.000000e+00> : vector<2x36xf32>
    %11 = tpu.matmul %9, %10, %cst_11 {dimension_numbers = #tpu.dot_dimension_numbers<[1], [0], [0], [1], [0, 0, 1, 1], [], []>} : vector<2x16xf32>, vector<16x36xf32>, vector<2x36xf32> -> vector<2x36xf32>
    %c0_12 = arith.constant 0 : index
    %c0_13 = arith.constant 0 : index
    %12 = vector.load %arg5[%c0_12, %c0_13] : memref<1x36xf32, #tpu.memory_space<vmem>>, vector<1x36xf32>
    %13 = vector.broadcast %12 : vector<1x36xf32> to vector<2x36xf32>
    %14 = arith.addf %11, %13 : vector<2x36xf32>
    %15 = math.absf %14 : vector<2x36xf32>
    %c0_14 = arith.constant 0 : index
    %c0_15 = arith.constant 0 : index
    %16 = vector.load %arg6[%c0_14, %c0_15] : memref<36x4xf32, #tpu.memory_space<vmem>>, vector<36x4xf32>
    %cst_16 = arith.constant dense<0.000000e+00> : vector<2x4xf32>
    %17 = tpu.matmul %15, %16, %cst_16 {dimension_numbers = #tpu.dot_dimension_numbers<[1], [0], [0], [1], [0, 0, 1, 1], [], []>} : vector<2x36xf32>, vector<36x4xf32>, vector<2x4xf32> -> vector<2x4xf32>
    %cst_17 = arith.constant 1.000000e-03 : f32
    %18 = vector.broadcast %cst_17 : f32 to vector<2x4xf32>
    %19 = arith.addf %17, %18 : vector<2x4xf32>
    %20 = tpu.reciprocal %19 {approx = true} : vector<2x4xf32> -> vector<2x4xf32>
    %cst_18 = arith.constant 0.000000e+00 : f32
    %21 = vector.broadcast %cst_18 : f32 to vector<16x128xf32>
    %22 = vector.extract_strided_slice %20 {offsets = [0, 0], sizes = [2, 1], strides = [1, 1]} : vector<2x4xf32> to vector<2x1xf32>
    %23 = vector.extract_strided_slice %14 {offsets = [0, 0], sizes = [2, 1], strides = [1, 1]} : vector<2x36xf32> to vector<2x1xf32>
    %24 = arith.mulf %23, %22 : vector<2x1xf32>
    %25 = vector.shape_cast %24 : vector<2x1xf32> to vector<2x1xf32>
    %26 = vector.broadcast %25 : vector<2x1xf32> to vector<2x32xf32>
    %27 = vector.extract_strided_slice %14 {offsets = [0, 1], sizes = [2, 1], strides = [1, 1]} : vector<2x36xf32> to vector<2x1xf32>
    %28 = arith.mulf %27, %22 : vector<2x1xf32>
    %29 = vector.shape_cast %28 : vector<2x1xf32> to vector<2x1xf32>
    %30 = vector.broadcast %29 : vector<2x1xf32> to vector<2x32xf32>
    %31 = vector.extract_strided_slice %14 {offsets = [0, 2], sizes = [2, 1], strides = [1, 1]} : vector<2x36xf32> to vector<2x1xf32>
    %32 = arith.mulf %31, %22 : vector<2x1xf32>
    %33 = vector.shape_cast %32 : vector<2x1xf32> to vector<2x1xf32>
    %34 = vector.broadcast %33 : vector<2x1xf32> to vector<2x32xf32>
    %35 = vector.extract_strided_slice %14 {offsets = [0, 3], sizes = [2, 1], strides = [1, 1]} : vector<2x36xf32> to vector<2x1xf32>
    %36 = arith.mulf %35, %22 : vector<2x1xf32>
    %37 = vector.shape_cast %36 : vector<2x1xf32> to vector<2x1xf32>
    %38 = vector.broadcast %37 : vector<2x1xf32> to vector<2x32xf32>
    %39 = tpu.concatenate %26, %30, %34, %38 in 1 : vector<2x32xf32>, vector<2x32xf32>, vector<2x32xf32>, vector<2x32xf32> -> vector<2x128xf32>
    %40 = vector.extract_strided_slice %39 {offsets = [0, 0], sizes = [1, 128], strides = [1, 1]} : vector<2x128xf32> to vector<1x128xf32>
    %41 = vector.shape_cast %40 : vector<1x128xf32> to vector<1x128xf32>
    %42 = vector.broadcast %41 : vector<1x128xf32> to vector<8x128xf32>
    %43 = vector.extract_strided_slice %39 {offsets = [1, 0], sizes = [1, 128], strides = [1, 1]} : vector<2x128xf32> to vector<1x128xf32>
    %44 = vector.shape_cast %43 : vector<1x128xf32> to vector<1x128xf32>
    %45 = vector.broadcast %44 : vector<1x128xf32> to vector<8x128xf32>
    %46 = tpu.concatenate %42, %45 in 0 : vector<8x128xf32>, vector<8x128xf32> -> vector<16x128xf32>
    %c0_19 = arith.constant 0 : index
    %c0_20 = arith.constant 0 : index
    %47 = vector.load %arg7[%c0_19, %c0_20] : memref<32x1024xbf16, #tpu.memory_space<vmem>>, vector<32x128xbf16>
    %cst_21 = arith.constant dense<0.000000e+00> : vector<16x128xf32>
    %48 = tpu.matmul %0, %47, %cst_21 {dimension_numbers = #tpu.dot_dimension_numbers<[1], [0], [0], [1], [0, 0, 1, 1], [], []>} : vector<16x32xbf16>, vector<32x128xbf16>, vector<16x128xf32> -> vector<16x128xf32>
    %49 = arith.mulf %46, %48 : vector<16x128xf32>
    %50 = arith.addf %21, %49 : vector<16x128xf32>
    %51 = vector.extract_strided_slice %20 {offsets = [0, 0], sizes = [2, 1], strides = [1, 1]} : vector<2x4xf32> to vector<2x1xf32>
    %52 = vector.extract_strided_slice %14 {offsets = [0, 4], sizes = [2, 1], strides = [1, 1]} : vector<2x36xf32> to vector<2x1xf32>
    %53 = arith.mulf %52, %51 : vector<2x1xf32>
    %54 = vector.shape_cast %53 : vector<2x1xf32> to vector<2x1xf32>
    %55 = vector.broadcast %54 : vector<2x1xf32> to vector<2x32xf32>
    %56 = vector.extract_strided_slice %14 {offsets = [0, 5], sizes = [2, 1], strides = [1, 1]} : vector<2x36xf32> to vector<2x1xf32>
    %57 = arith.mulf %56, %51 : vector<2x1xf32>
    %58 = vector.shape_cast %57 : vector<2x1xf32> to vector<2x1xf32>
    %59 = vector.broadcast %58 : vector<2x1xf32> to vector<2x32xf32>
    %60 = vector.extract_strided_slice %14 {offsets = [0, 6], sizes = [2, 1], strides = [1, 1]} : vector<2x36xf32> to vector<2x1xf32>
    %61 = arith.mulf %60, %51 : vector<2x1xf32>
    %62 = vector.shape_cast %61 : vector<2x1xf32> to vector<2x1xf32>
    %63 = vector.broadcast %62 : vector<2x1xf32> to vector<2x32xf32>
    %64 = vector.extract_strided_slice %14 {offsets = [0, 7], sizes = [2, 1], strides = [1, 1]} : vector<2x36xf32> to vector<2x1xf32>
    %65 = arith.mulf %64, %51 : vector<2x1xf32>
    %66 = vector.shape_cast %65 : vector<2x1xf32> to vector<2x1xf32>
    %67 = vector.broadcast %66 : vector<2x1xf32> to vector<2x32xf32>
    %68 = tpu.concatenate %55, %59, %63, %67 in 1 : vector<2x32xf32>, vector<2x32xf32>, vector<2x32xf32>, vector<2x32xf32> -> vector<2x128xf32>
    %69 = vector.extract_strided_slice %68 {offsets = [0, 0], sizes = [1, 128], strides = [1, 1]} : vector<2x128xf32> to vector<1x128xf32>
    %70 = vector.shape_cast %69 : vector<1x128xf32> to vector<1x128xf32>
    %71 = vector.broadcast %70 : vector<1x128xf32> to vector<8x128xf32>
    %72 = vector.extract_strided_slice %68 {offsets = [1, 0], sizes = [1, 128], strides = [1, 1]} : vector<2x128xf32> to vector<1x128xf32>
    %73 = vector.shape_cast %72 : vector<1x128xf32> to vector<1x128xf32>
    %74 = vector.broadcast %73 : vector<1x128xf32> to vector<8x128xf32>
    %75 = tpu.concatenate %71, %74 in 0 : vector<8x128xf32>, vector<8x128xf32> -> vector<16x128xf32>
    %c0_22 = arith.constant 0 : index
    %c128 = arith.constant 128 : index
    %76 = vector.load %arg7[%c0_22, %c128] : memref<32x1024xbf16, #tpu.memory_space<vmem>>, vector<32x128xbf16>
    %cst_23 = arith.constant dense<0.000000e+00> : vector<16x128xf32>
    %77 = tpu.matmul %0, %76, %cst_23 {dimension_numbers = #tpu.dot_dimension_numbers<[1], [0], [0], [1], [0, 0, 1, 1], [], []>} : vector<16x32xbf16>, vector<32x128xbf16>, vector<16x128xf32> -> vector<16x128xf32>
    %78 = arith.mulf %75, %77 : vector<16x128xf32>
    %79 = arith.addf %50, %78 : vector<16x128xf32>
    %80 = vector.extract_strided_slice %20 {offsets = [0, 1], sizes = [2, 1], strides = [1, 1]} : vector<2x4xf32> to vector<2x1xf32>
    %81 = vector.extract_strided_slice %14 {offsets = [0, 9], sizes = [2, 1], strides = [1, 1]} : vector<2x36xf32> to vector<2x1xf32>
    %82 = arith.mulf %81, %80 : vector<2x1xf32>
    %83 = vector.shape_cast %82 : vector<2x1xf32> to vector<2x1xf32>
    %84 = vector.broadcast %83 : vector<2x1xf32> to vector<2x32xf32>
    %85 = vector.extract_strided_slice %14 {offsets = [0, 10], sizes = [2, 1], strides = [1, 1]} : vector<2x36xf32> to vector<2x1xf32>
    %86 = arith.mulf %85, %80 : vector<2x1xf32>
    %87 = vector.shape_cast %86 : vector<2x1xf32> to vector<2x1xf32>
    %88 = vector.broadcast %87 : vector<2x1xf32> to vector<2x32xf32>
    %89 = vector.extract_strided_slice %14 {offsets = [0, 11], sizes = [2, 1], strides = [1, 1]} : vector<2x36xf32> to vector<2x1xf32>
    %90 = arith.mulf %89, %80 : vector<2x1xf32>
    %91 = vector.shape_cast %90 : vector<2x1xf32> to vector<2x1xf32>
    %92 = vector.broadcast %91 : vector<2x1xf32> to vector<2x32xf32>
    %93 = vector.extract_strided_slice %14 {offsets = [0, 12], sizes = [2, 1], strides = [1, 1]} : vector<2x36xf32> to vector<2x1xf32>
    %94 = arith.mulf %93, %80 : vector<2x1xf32>
    %95 = vector.shape_cast %94 : vector<2x1xf32> to vector<2x1xf32>
    %96 = vector.broadcast %95 : vector<2x1xf32> to vector<2x32xf32>
    %97 = tpu.concatenate %84, %88, %92, %96 in 1 : vector<2x32xf32>, vector<2x32xf32>, vector<2x32xf32>, vector<2x32xf32> -> vector<2x128xf32>
    %98 = vector.extract_strided_slice %97 {offsets = [0, 0], sizes = [1, 128], strides = [1, 1]} : vector<2x128xf32> to vector<1x128xf32>
    %99 = vector.shape_cast %98 : vector<1x128xf32> to vector<1x128xf32>
    %100 = vector.broadcast %99 : vector<1x128xf32> to vector<8x128xf32>
    %101 = vector.extract_strided_slice %97 {offsets = [1, 0], sizes = [1, 128], strides = [1, 1]} : vector<2x128xf32> to vector<1x128xf32>
    %102 = vector.shape_cast %101 : vector<1x128xf32> to vector<1x128xf32>
    %103 = vector.broadcast %102 : vector<1x128xf32> to vector<8x128xf32>
    %104 = tpu.concatenate %100, %103 in 0 : vector<8x128xf32>, vector<8x128xf32> -> vector<16x128xf32>
    %c0_24 = arith.constant 0 : index
    %c256 = arith.constant 256 : index
    %105 = vector.load %arg7[%c0_24, %c256] : memref<32x1024xbf16, #tpu.memory_space<vmem>>, vector<32x128xbf16>
    %cst_25 = arith.constant dense<0.000000e+00> : vector<16x128xf32>
    %106 = tpu.matmul %0, %105, %cst_25 {dimension_numbers = #tpu.dot_dimension_numbers<[1], [0], [0], [1], [0, 0, 1, 1], [], []>} : vector<16x32xbf16>, vector<32x128xbf16>, vector<16x128xf32> -> vector<16x128xf32>
    %107 = arith.mulf %104, %106 : vector<16x128xf32>
    %108 = arith.addf %79, %107 : vector<16x128xf32>
    %109 = vector.extract_strided_slice %20 {offsets = [0, 1], sizes = [2, 1], strides = [1, 1]} : vector<2x4xf32> to vector<2x1xf32>
    %110 = vector.extract_strided_slice %14 {offsets = [0, 13], sizes = [2, 1], strides = [1, 1]} : vector<2x36xf32> to vector<2x1xf32>
    %111 = arith.mulf %110, %109 : vector<2x1xf32>
    %112 = vector.shape_cast %111 : vector<2x1xf32> to vector<2x1xf32>
    %113 = vector.broadcast %112 : vector<2x1xf32> to vector<2x32xf32>
    %114 = vector.extract_strided_slice %14 {offsets = [0, 14], sizes = [2, 1], strides = [1, 1]} : vector<2x36xf32> to vector<2x1xf32>
    %115 = arith.mulf %114, %109 : vector<2x1xf32>
    %116 = vector.shape_cast %115 : vector<2x1xf32> to vector<2x1xf32>
    %117 = vector.broadcast %116 : vector<2x1xf32> to vector<2x32xf32>
    %118 = vector.extract_strided_slice %14 {offsets = [0, 15], sizes = [2, 1], strides = [1, 1]} : vector<2x36xf32> to vector<2x1xf32>
    %119 = arith.mulf %118, %109 : vector<2x1xf32>
    %120 = vector.shape_cast %119 : vector<2x1xf32> to vector<2x1xf32>
    %121 = vector.broadcast %120 : vector<2x1xf32> to vector<2x32xf32>
    %122 = vector.extract_strided_slice %14 {offsets = [0, 16], sizes = [2, 1], strides = [1, 1]} : vector<2x36xf32> to vector<2x1xf32>
    %123 = arith.mulf %122, %109 : vector<2x1xf32>
    %124 = vector.shape_cast %123 : vector<2x1xf32> to vector<2x1xf32>
    %125 = vector.broadcast %124 : vector<2x1xf32> to vector<2x32xf32>
    %126 = tpu.concatenate %113, %117, %121, %125 in 1 : vector<2x32xf32>, vector<2x32xf32>, vector<2x32xf32>, vector<2x32xf32> -> vector<2x128xf32>
    %127 = vector.extract_strided_slice %126 {offsets = [0, 0], sizes = [1, 128], strides = [1, 1]} : vector<2x128xf32> to vector<1x128xf32>
    %128 = vector.shape_cast %127 : vector<1x128xf32> to vector<1x128xf32>
    %129 = vector.broadcast %128 : vector<1x128xf32> to vector<8x128xf32>
    %130 = vector.extract_strided_slice %126 {offsets = [1, 0], sizes = [1, 128], strides = [1, 1]} : vector<2x128xf32> to vector<1x128xf32>
    %131 = vector.shape_cast %130 : vector<1x128xf32> to vector<1x128xf32>
    %132 = vector.broadcast %131 : vector<1x128xf32> to vector<8x128xf32>
    %133 = tpu.concatenate %129, %132 in 0 : vector<8x128xf32>, vector<8x128xf32> -> vector<16x128xf32>
    %c0_26 = arith.constant 0 : index
    %c384 = arith.constant 384 : index
    %134 = vector.load %arg7[%c0_26, %c384] : memref<32x1024xbf16, #tpu.memory_space<vmem>>, vector<32x128xbf16>
    %cst_27 = arith.constant dense<0.000000e+00> : vector<16x128xf32>
    %135 = tpu.matmul %0, %134, %cst_27 {dimension_numbers = #tpu.dot_dimension_numbers<[1], [0], [0], [1], [0, 0, 1, 1], [], []>} : vector<16x32xbf16>, vector<32x128xbf16>, vector<16x128xf32> -> vector<16x128xf32>
    %136 = arith.mulf %133, %135 : vector<16x128xf32>
    %137 = arith.addf %108, %136 : vector<16x128xf32>
    %138 = vector.extract_strided_slice %20 {offsets = [0, 2], sizes = [2, 1], strides = [1, 1]} : vector<2x4xf32> to vector<2x1xf32>
    %139 = vector.extract_strided_slice %14 {offsets = [0, 18], sizes = [2, 1], strides = [1, 1]} : vector<2x36xf32> to vector<2x1xf32>
    %140 = arith.mulf %139, %138 : vector<2x1xf32>
    %141 = vector.shape_cast %140 : vector<2x1xf32> to vector<2x1xf32>
    %142 = vector.broadcast %141 : vector<2x1xf32> to vector<2x32xf32>
    %143 = vector.extract_strided_slice %14 {offsets = [0, 19], sizes = [2, 1], strides = [1, 1]} : vector<2x36xf32> to vector<2x1xf32>
    %144 = arith.mulf %143, %138 : vector<2x1xf32>
    %145 = vector.shape_cast %144 : vector<2x1xf32> to vector<2x1xf32>
    %146 = vector.broadcast %145 : vector<2x1xf32> to vector<2x32xf32>
    %147 = vector.extract_strided_slice %14 {offsets = [0, 20], sizes = [2, 1], strides = [1, 1]} : vector<2x36xf32> to vector<2x1xf32>
    %148 = arith.mulf %147, %138 : vector<2x1xf32>
    %149 = vector.shape_cast %148 : vector<2x1xf32> to vector<2x1xf32>
    %150 = vector.broadcast %149 : vector<2x1xf32> to vector<2x32xf32>
    %151 = vector.extract_strided_slice %14 {offsets = [0, 21], sizes = [2, 1], strides = [1, 1]} : vector<2x36xf32> to vector<2x1xf32>
    %152 = arith.mulf %151, %138 : vector<2x1xf32>
    %153 = vector.shape_cast %152 : vector<2x1xf32> to vector<2x1xf32>
    %154 = vector.broadcast %153 : vector<2x1xf32> to vector<2x32xf32>
    %155 = tpu.concatenate %142, %146, %150, %154 in 1 : vector<2x32xf32>, vector<2x32xf32>, vector<2x32xf32>, vector<2x32xf32> -> vector<2x128xf32>
    %156 = vector.extract_strided_slice %155 {offsets = [0, 0], sizes = [1, 128], strides = [1, 1]} : vector<2x128xf32> to vector<1x128xf32>
    %157 = vector.shape_cast %156 : vector<1x128xf32> to vector<1x128xf32>
    %158 = vector.broadcast %157 : vector<1x128xf32> to vector<8x128xf32>
    %159 = vector.extract_strided_slice %155 {offsets = [1, 0], sizes = [1, 128], strides = [1, 1]} : vector<2x128xf32> to vector<1x128xf32>
    %160 = vector.shape_cast %159 : vector<1x128xf32> to vector<1x128xf32>
    %161 = vector.broadcast %160 : vector<1x128xf32> to vector<8x128xf32>
    %162 = tpu.concatenate %158, %161 in 0 : vector<8x128xf32>, vector<8x128xf32> -> vector<16x128xf32>
    %c0_28 = arith.constant 0 : index
    %c512 = arith.constant 512 : index
    %163 = vector.load %arg7[%c0_28, %c512] : memref<32x1024xbf16, #tpu.memory_space<vmem>>, vector<32x128xbf16>
    %cst_29 = arith.constant dense<0.000000e+00> : vector<16x128xf32>
    %164 = tpu.matmul %0, %163, %cst_29 {dimension_numbers = #tpu.dot_dimension_numbers<[1], [0], [0], [1], [0, 0, 1, 1], [], []>} : vector<16x32xbf16>, vector<32x128xbf16>, vector<16x128xf32> -> vector<16x128xf32>
    %165 = arith.mulf %162, %164 : vector<16x128xf32>
    %166 = arith.addf %137, %165 : vector<16x128xf32>
    %167 = vector.extract_strided_slice %20 {offsets = [0, 2], sizes = [2, 1], strides = [1, 1]} : vector<2x4xf32> to vector<2x1xf32>
    %168 = vector.extract_strided_slice %14 {offsets = [0, 22], sizes = [2, 1], strides = [1, 1]} : vector<2x36xf32> to vector<2x1xf32>
    %169 = arith.mulf %168, %167 : vector<2x1xf32>
    %170 = vector.shape_cast %169 : vector<2x1xf32> to vector<2x1xf32>
    %171 = vector.broadcast %170 : vector<2x1xf32> to vector<2x32xf32>
    %172 = vector.extract_strided_slice %14 {offsets = [0, 23], sizes = [2, 1], strides = [1, 1]} : vector<2x36xf32> to vector<2x1xf32>
    %173 = arith.mulf %172, %167 : vector<2x1xf32>
    %174 = vector.shape_cast %173 : vector<2x1xf32> to vector<2x1xf32>
    %175 = vector.broadcast %174 : vector<2x1xf32> to vector<2x32xf32>
    %176 = vector.extract_strided_slice %14 {offsets = [0, 24], sizes = [2, 1], strides = [1, 1]} : vector<2x36xf32> to vector<2x1xf32>
    %177 = arith.mulf %176, %167 : vector<2x1xf32>
    %178 = vector.shape_cast %177 : vector<2x1xf32> to vector<2x1xf32>
    %179 = vector.broadcast %178 : vector<2x1xf32> to vector<2x32xf32>
    %180 = vector.extract_strided_slice %14 {offsets = [0, 25], sizes = [2, 1], strides = [1, 1]} : vector<2x36xf32> to vector<2x1xf32>
    %181 = arith.mulf %180, %167 : vector<2x1xf32>
    %182 = vector.shape_cast %181 : vector<2x1xf32> to vector<2x1xf32>
    %183 = vector.broadcast %182 : vector<2x1xf32> to vector<2x32xf32>
    %184 = tpu.concatenate %171, %175, %179, %183 in 1 : vector<2x32xf32>, vector<2x32xf32>, vector<2x32xf32>, vector<2x32xf32> -> vector<2x128xf32>
    %185 = vector.extract_strided_slice %184 {offsets = [0, 0], sizes = [1, 128], strides = [1, 1]} : vector<2x128xf32> to vector<1x128xf32>
    %186 = vector.shape_cast %185 : vector<1x128xf32> to vector<1x128xf32>
    %187 = vector.broadcast %186 : vector<1x128xf32> to vector<8x128xf32>
    %188 = vector.extract_strided_slice %184 {offsets = [1, 0], sizes = [1, 128], strides = [1, 1]} : vector<2x128xf32> to vector<1x128xf32>
    %189 = vector.shape_cast %188 : vector<1x128xf32> to vector<1x128xf32>
    %190 = vector.broadcast %189 : vector<1x128xf32> to vector<8x128xf32>
    %191 = tpu.concatenate %187, %190 in 0 : vector<8x128xf32>, vector<8x128xf32> -> vector<16x128xf32>
    %c0_30 = arith.constant 0 : index
    %c640 = arith.constant 640 : index
    %192 = vector.load %arg7[%c0_30, %c640] : memref<32x1024xbf16, #tpu.memory_space<vmem>>, vector<32x128xbf16>
    %cst_31 = arith.constant dense<0.000000e+00> : vector<16x128xf32>
    %193 = tpu.matmul %0, %192, %cst_31 {dimension_numbers = #tpu.dot_dimension_numbers<[1], [0], [0], [1], [0, 0, 1, 1], [], []>} : vector<16x32xbf16>, vector<32x128xbf16>, vector<16x128xf32> -> vector<16x128xf32>
    %194 = arith.mulf %191, %193 : vector<16x128xf32>
    %195 = arith.addf %166, %194 : vector<16x128xf32>
    %196 = vector.extract_strided_slice %20 {offsets = [0, 3], sizes = [2, 1], strides = [1, 1]} : vector<2x4xf32> to vector<2x1xf32>
    %197 = vector.extract_strided_slice %14 {offsets = [0, 27], sizes = [2, 1], strides = [1, 1]} : vector<2x36xf32> to vector<2x1xf32>
    %198 = arith.mulf %197, %196 : vector<2x1xf32>
    %199 = vector.shape_cast %198 : vector<2x1xf32> to vector<2x1xf32>
    %200 = vector.broadcast %199 : vector<2x1xf32> to vector<2x32xf32>
    %201 = vector.extract_strided_slice %14 {offsets = [0, 28], sizes = [2, 1], strides = [1, 1]} : vector<2x36xf32> to vector<2x1xf32>
    %202 = arith.mulf %201, %196 : vector<2x1xf32>
    %203 = vector.shape_cast %202 : vector<2x1xf32> to vector<2x1xf32>
    %204 = vector.broadcast %203 : vector<2x1xf32> to vector<2x32xf32>
    %205 = vector.extract_strided_slice %14 {offsets = [0, 29], sizes = [2, 1], strides = [1, 1]} : vector<2x36xf32> to vector<2x1xf32>
    %206 = arith.mulf %205, %196 : vector<2x1xf32>
    %207 = vector.shape_cast %206 : vector<2x1xf32> to vector<2x1xf32>
    %208 = vector.broadcast %207 : vector<2x1xf32> to vector<2x32xf32>
    %209 = vector.extract_strided_slice %14 {offsets = [0, 30], sizes = [2, 1], strides = [1, 1]} : vector<2x36xf32> to vector<2x1xf32>
    %210 = arith.mulf %209, %196 : vector<2x1xf32>
    %211 = vector.shape_cast %210 : vector<2x1xf32> to vector<2x1xf32>
    %212 = vector.broadcast %211 : vector<2x1xf32> to vector<2x32xf32>
    %213 = tpu.concatenate %200, %204, %208, %212 in 1 : vector<2x32xf32>, vector<2x32xf32>, vector<2x32xf32>, vector<2x32xf32> -> vector<2x128xf32>
    %214 = vector.extract_strided_slice %213 {offsets = [0, 0], sizes = [1, 128], strides = [1, 1]} : vector<2x128xf32> to vector<1x128xf32>
    %215 = vector.shape_cast %214 : vector<1x128xf32> to vector<1x128xf32>
    %216 = vector.broadcast %215 : vector<1x128xf32> to vector<8x128xf32>
    %217 = vector.extract_strided_slice %213 {offsets = [1, 0], sizes = [1, 128], strides = [1, 1]} : vector<2x128xf32> to vector<1x128xf32>
    %218 = vector.shape_cast %217 : vector<1x128xf32> to vector<1x128xf32>
    %219 = vector.broadcast %218 : vector<1x128xf32> to vector<8x128xf32>
    %220 = tpu.concatenate %216, %219 in 0 : vector<8x128xf32>, vector<8x128xf32> -> vector<16x128xf32>
    %c0_32 = arith.constant 0 : index
    %c768 = arith.constant 768 : index
    %221 = vector.load %arg7[%c0_32, %c768] : memref<32x1024xbf16, #tpu.memory_space<vmem>>, vector<32x128xbf16>
    %cst_33 = arith.constant dense<0.000000e+00> : vector<16x128xf32>
    %222 = tpu.matmul %0, %221, %cst_33 {dimension_numbers = #tpu.dot_dimension_numbers<[1], [0], [0], [1], [0, 0, 1, 1], [], []>} : vector<16x32xbf16>, vector<32x128xbf16>, vector<16x128xf32> -> vector<16x128xf32>
    %223 = arith.mulf %220, %222 : vector<16x128xf32>
    %224 = arith.addf %195, %223 : vector<16x128xf32>
    %225 = vector.extract_strided_slice %20 {offsets = [0, 3], sizes = [2, 1], strides = [1, 1]} : vector<2x4xf32> to vector<2x1xf32>
    %226 = vector.extract_strided_slice %14 {offsets = [0, 31], sizes = [2, 1], strides = [1, 1]} : vector<2x36xf32> to vector<2x1xf32>
    %227 = arith.mulf %226, %225 : vector<2x1xf32>
    %228 = vector.shape_cast %227 : vector<2x1xf32> to vector<2x1xf32>
    %229 = vector.broadcast %228 : vector<2x1xf32> to vector<2x32xf32>
    %230 = vector.extract_strided_slice %14 {offsets = [0, 32], sizes = [2, 1], strides = [1, 1]} : vector<2x36xf32> to vector<2x1xf32>
    %231 = arith.mulf %230, %225 : vector<2x1xf32>
    %232 = vector.shape_cast %231 : vector<2x1xf32> to vector<2x1xf32>
    %233 = vector.broadcast %232 : vector<2x1xf32> to vector<2x32xf32>
    %234 = vector.extract_strided_slice %14 {offsets = [0, 33], sizes = [2, 1], strides = [1, 1]} : vector<2x36xf32> to vector<2x1xf32>
    %235 = arith.mulf %234, %225 : vector<2x1xf32>
    %236 = vector.shape_cast %235 : vector<2x1xf32> to vector<2x1xf32>
    %237 = vector.broadcast %236 : vector<2x1xf32> to vector<2x32xf32>
    %238 = vector.extract_strided_slice %14 {offsets = [0, 34], sizes = [2, 1], strides = [1, 1]} : vector<2x36xf32> to vector<2x1xf32>
    %239 = arith.mulf %238, %225 : vector<2x1xf32>
    %240 = vector.shape_cast %239 : vector<2x1xf32> to vector<2x1xf32>
    %241 = vector.broadcast %240 : vector<2x1xf32> to vector<2x32xf32>
    %242 = tpu.concatenate %229, %233, %237, %241 in 1 : vector<2x32xf32>, vector<2x32xf32>, vector<2x32xf32>, vector<2x32xf32> -> vector<2x128xf32>
    %243 = vector.extract_strided_slice %242 {offsets = [0, 0], sizes = [1, 128], strides = [1, 1]} : vector<2x128xf32> to vector<1x128xf32>
    %244 = vector.shape_cast %243 : vector<1x128xf32> to vector<1x128xf32>
    %245 = vector.broadcast %244 : vector<1x128xf32> to vector<8x128xf32>
    %246 = vector.extract_strided_slice %242 {offsets = [1, 0], sizes = [1, 128], strides = [1, 1]} : vector<2x128xf32> to vector<1x128xf32>
    %247 = vector.shape_cast %246 : vector<1x128xf32> to vector<1x128xf32>
    %248 = vector.broadcast %247 : vector<1x128xf32> to vector<8x128xf32>
    %249 = tpu.concatenate %245, %248 in 0 : vector<8x128xf32>, vector<8x128xf32> -> vector<16x128xf32>
    %c0_34 = arith.constant 0 : index
    %c896 = arith.constant 896 : index
    %250 = vector.load %arg7[%c0_34, %c896] : memref<32x1024xbf16, #tpu.memory_space<vmem>>, vector<32x128xbf16>
    %cst_35 = arith.constant dense<0.000000e+00> : vector<16x128xf32>
    %251 = tpu.matmul %0, %250, %cst_35 {dimension_numbers = #tpu.dot_dimension_numbers<[1], [0], [0], [1], [0, 0, 1, 1], [], []>} : vector<16x32xbf16>, vector<32x128xbf16>, vector<16x128xf32> -> vector<16x128xf32>
    %252 = arith.mulf %249, %251 : vector<16x128xf32>
    %253 = arith.addf %224, %252 : vector<16x128xf32>
    %c64_i32 = arith.constant 64 : i32
    %254 = tpu.dynamic_rotate %253 by %c64_i32 dim 1 : vector<16x128xf32>, i32 -> vector<16x128xf32>
    %255 = arith.addf %253, %254 : vector<16x128xf32>
    %c32_i32 = arith.constant 32 : i32
    %256 = tpu.dynamic_rotate %255 by %c32_i32 dim 1 : vector<16x128xf32>, i32 -> vector<16x128xf32>
    %257 = arith.addf %255, %256 : vector<16x128xf32>
    %258 = vector.extract_strided_slice %257 {offsets = [0, 0], sizes = [16, 32], strides = [1, 1]} : vector<16x128xf32> to vector<16x32xf32>
    %c0_36 = arith.constant 0 : index
    %c0_37 = arith.constant 0 : index
    %259 = vector.load %arg8[%c0_36, %c0_37] : memref<16x32xf32, #tpu.memory_space<vmem>>, vector<16x32xf32>
    tpu.vector_store %arg8[%c0_36, %c0_37], %258 {strides = array<i32>} : memref<16x32xf32, #tpu.memory_space<vmem>>, vector<16x32xf32>,
    return
  }
}

</mosaic_0001>

<bundles_post_ra>
// kernel: tpu_custom_call.1
= control target key start
LH: loop header
LB: loop body
LE: loop exit
PB: predicated region body
PF: predicated region fallthrough
CT: control target
= control target key end

     0   :  { %13 = vsyncpa [#allocation3], 0  ;;  %s1352_s0 = inlined_call_operand.vmem [shape: bf16[16,32], index: 0, kind: input, shape index: {}]   ;;  %s1353_s1 = inlined_call_operand.vmem [shape: bf16[2,16], index: 1, kind: input, shape index: {}]   ;;  %s1354_s2 = inlined_call_operand.vmem [shape: f32[32,16], index: 2, kind: input, shape index: {}]   ;;  %s1355_s3 = inlined_call_operand.vmem [shape: f32[1,16], index: 3, kind: input, shape index: {}]   ;;  %s1356_s4 = inlined_call_operand.vmem [shape: f32[16,36], index: 4, kind: input, shape index: {}]   ;;  %s1357_s5 = inlined_call_operand.vmem [shape: f32[1,36], index: 5, kind: input, shape index: {}]   ;;  %s1358_s6 = inlined_call_operand.vmem [shape: f32[36,4], index: 6, kind: input, shape index: {}]   ;;  %s1359_s7 = inlined_call_operand.hbm [shape: bf16[32,1024], index: 7, kind: input, shape index: {}]   ;;  %s1360_s8 = inlined_call_operand.hbm [shape: f32[16,32], index: 8, kind: output, shape index: {}]  }
   0x1   :  { %14 = vsyncpa [#allocation4], 0  ;;  %s33_s29 = sshll.u32 %s1359_s7, 4  ;;  %s1062_s30 = smov [#allocation2]   ;;  %s34_s29 = int_to_ptr.hbm [resolvable:$true] %s33_s29 }
   0x2   :  { %s35_s9 = sshll.u32 %s1062_s30, 4  ;;  %s1063_s10 = smov 512   ;;  %s36_s9 = int_to_ptr.vmem [resolvable:$true] %s35_s9 }
   0x3   :  { %s1064_s11 = smov 32  }
   0x4   :  { %41 = dma.hbm_to_vmem [thread:$0]  %s34_s29, 2048, %s36_s9, [#allocation3], %s1063_s10, %s1063_s10, %s1064_s11  }
   0x5   :  { %1058 = dma.done.wait [#allocation3], 2048  }
   0x6   :  { %1059 = vsyncadd [#allocation3], 4294965248  ;;  %v1183_v0 = vld [vmem:[%s1352_s0] sm:$0xff]  ;;  %v76_v1 = vld [vmem:[%s1354_s2 + $0x18] sm:$0xff]  ;;  %vm56_vm0 = vcmask 130048   ;;  %vm81_vm1 = vcmask 261120  }
   0x7   :  { %97 = vmatpush.msra.mxu1 %v76_v1  ;;  %v75_v2 = vld [vmem:[%s1354_s2 + $0x10] sm:$0xff]  ;;  %67 = vmatpush.bf16.msra.mxu0 %v1183_v0  ;;  %v49_v3 = vld [vmem:[%s1353_s1] sm:$0x1]  ;;  %v74_v4 = vld [vmem:[%s1354_s2 + $0x8] sm:$0xff]  ;;  %vm145_vm2 = vcmask 1043456   ;;  %vm141_vm3 = vcmask 293888  }
   0x8   :  { %v73_v5 = vld [vmem:[%s1354_s2] sm:$0xff]  ;;  %v107_v8 = vld [vmem:[%s1356_s4 + $0x8] sm:$0xff]  ;;  %v139_v11 = vld [vmem:[%s1358_s6 + $0x18] sm:$0xff]  ;;  %s1065_s15 = smov 3   ;;  %s1067_s7 = smov 1   ;;  %v1080_v26 = vmov 0  }
   0x9   :  { %98 = vmatpush.msra.mxu1 %v75_v2  ;;  %129 = vmatpush.msra.mxu2 %v107_v8  ;;  %v106_v9 = vld [vmem:[%s1356_s4] sm:$0xff]  ;;  %v138_v16 = vld [vmem:[%s1358_s6 + $0x10] sm:$0xff]  ;;  %v137_v17 = vld [vmem:[%s1358_s6 + $0x8] sm:$0xff]  ;;  %s1069_s16 = smov 4   ;;  %s1070_s17 = smov 6   ;;  %v1095_v46 = vmov 3  }
   0xa   :  { %810 = vmatmul.msk.bf16.vlgmr.msra.gmra.mxu0 %vm56_vm0, %v49_v3  ;;  %v140_v10 = vld [vmem:[%s1358_s6 + $0x20] sm:$0xf]  ;;  %s1071_s18 = smov 11   ;;  %s1072_s19 = smov 5   ;;  %973 = vset.pattern.permute.xlu0 %v1080_v26  ;;  %v830_v33 = vld [vmem:[#allocation2 + $0x44] sm:$0xf] }
   0xb   :  { %99 = vmatpush.msra.mxu1 %v74_v4  ;;  %130 = vmatpush.msra.mxu2 %v106_v9  ;;  %v1006_v12 = vld [vmem:[%s1355_s3] ss:$0 sm:$0xff]  ;;  %s1073_s20 = smov 10   ;;  %s1074_s0 = smov 16   ;;  %v891_v34 = vld [vmem:[#allocation2 + $0x60] sm:$0xf0] }
   0xc   :  { %813 = vmatpush.msk.msra.mxu3 %vm145_vm2, %v140_v10  ;;  %v136_v18 = vld [vmem:[%s1358_s6] sm:$0xff]  ;;  %s1066_s6 = smov 2   ;;  %s1075_s21 = smov 8   ;;  %v831_v36 = vor.u32 %v891_v34, %v830_v33  ;;  %v839_v37 = vld [vmem:[#allocation2 + $0x48] sm:$0xf]  ;;  %v1096_v47 = vmov 2  }
   0xd   :  { %100 = vmatpush.msra.mxu1 %v73_v5  ;;  %v1007_v19 = vld [vmem:[%s1357_s5] ss:$0 sm:$0xff]  ;;  %s1068_s5 = smov 7   ;;  %s1076_s1 = smov 14   ;;  %v893_v38 = vld [vmem:[#allocation2 + $0x64] sm:$0xf0]  ;;  %975 = vset.pattern.permute.xlu2 %v1096_v47 }
   0xe   :  { %161 = vmatpush.msra.mxu3 %v139_v11  ;;  %s1077_s22 = smov 19   ;;  %s1078_s23 = smov 9   ;;  %v821_v27 = vld [vmem:[#allocation2 + $0x40] sm:$0xf]  ;;  %v840_v39 = vor.u32 %v893_v38, %v839_v37  ;;  %v826_v40 = vld [vmem:[#allocation2 + $0x4] sm:$0xf] }
   0xf   :  { %s1079_s24 = smov 17   ;;  %s1081_s25 = smov 22   ;;  %v889_v28 = vld [vmem:[#allocation2 + $0x5c] sm:$0xf0]  ;;  %311 = vmatpush.bf16.msrb.mxu1 %v831_v36  ;;  %v890_v41 = vld [vmem:[#allocation2 + $0x20] sm:$0xf0] }
  0x10   :  { %162 = vmatpush.msra.mxu3 %v138_v16  ;;  %s1082_s26 = smov 12   ;;  %s1083_s2 = smov 20   ;;  %v822_v29 = vor.u32 %v889_v28, %v821_v27  ;;  %v817_v30 = vld [vmem:[#allocation2] sm:$0xf]  ;;  %v827_v42 = vor.u32 %v890_v41, %v826_v40  ;;  %v835_v43 = vld [vmem:[#allocation2 + $0x8] sm:$0xf] }
  0x11   :  { %s1084_s27 = smov 25   ;;  %s1085_s28 = smov 13   ;;  %v888_v31 = vld [vmem:[#allocation2 + $0x1c] sm:$0xf0]  ;;  %v892_v44 = vld [vmem:[#allocation2 + $0x24] sm:$0xf0] }
  0x12   :  { %163 = vmatpush.msra.mxu3 %v137_v17  ;;  %s1086_s29 = smov 23   ;;  %s1087_s4 = smov 28   ;;  %236 = vmatpush.bf16.msrb.mxu2 %v822_v29  ;;  %v818_v32 = vor.u32 %v888_v31, %v817_v30  ;;  %v836_v45 = vor.u32 %v892_v44, %v835_v43  ;;  %v1097_v48 = vmov 1   ;;  %v1100_v53 = vmov 7   ;;  %v848_v61 = vld [vmem:[#allocation2 + $0x4c] sm:$0xf] }
  0x13   :  { %s1088_s30 = smov 15   ;;  %s1089_s9 = smov 26   ;;  %312 = vmatpush.bf16.msrb.mxu1 %v827_v42  ;;  %974 = vset.pattern.permute.xlu1 %v1097_v48  ;;  %v1101_v56 = vmov 12   ;;  %v895_v62 = vld [vmem:[#allocation2 + $0x68] sm:$0xf0]  ;;  %v1102_v1 = vmov 15  }
  0x14   :  { %164 = vmatpush.msra.mxu3 %v136_v18  ;;  %s1090_s10 = smov 31   ;;  %s1091_s12 = smov 18   ;;  %v849_v63 = vor.u32 %v895_v62, %v848_v61  ;;  %v844_v2 = vld [vmem:[#allocation2 + $0xc] sm:$0xf]  ;;  %v857_v5 = vld [vmem:[#allocation2 + $0x50] sm:$0xf] }
  0x15   :  { %s1092_s13 = smov 29   ;;  %s1093_s3 = smov 21   ;;  %v894_v3 = vld [vmem:[#allocation2 + $0x28] sm:$0xf0]  ;;  %v1104_v16 = vmov 6   ;;  %v1108_v33 = vmov 16  }
  0x16   :  { %237 = vmatpush.bf16.msrb.mxu2 %v818_v32  ;;  %386 = vmatpush.bf16.msrb.mxu3 %v840_v39  ;;  %s1094_s14 = smov 24   ;;  %v845_v4 = vor.u32 %v894_v3, %v844_v2  ;;  %v866_v28 = vld [vmem:[#allocation2 + $0x54] sm:$0xf]  ;;  %v1107_v32 = vmov 9   ;;  %v1109_v40 = vmov 21   ;;  %v1110_v42 = vmov 10  }
  0x17   :  { %461 = vmatpush.bf16.msrb.mxu0 %v849_v63  ;;  %v899_v29 = vld [vmem:[#allocation2 + $0x70] sm:$0xf0]  ;;  %v875_v44 = vld [vmem:[#allocation2 + $0x58] sm:$0xf]  ;;  %v884_v61 = vld [vmem:[#allocation2 + $0x5c] sm:$0xf] }
  0x18   :  { %v867_v31 = vor.u32 %v899_v29, %v866_v28  ;;  %v862_v36 = vld [vmem:[#allocation2 + $0x14] sm:$0xf]  ;;  %v871_v47 = vld [vmem:[#allocation2 + $0x18] sm:$0xf]  ;;  %v903_v62 = vld [vmem:[#allocation2 + $0x78] sm:$0xf0] }
  0x19   :  { %v898_v37 = vld [vmem:[#allocation2 + $0x30] sm:$0xf0]  ;;  %v900_v48 = vld [vmem:[#allocation2 + $0x34] sm:$0xf0]  ;;  %v885_v63 = vor.u32 %v903_v62, %v884_v61  ;;  %v902_v2 = vld [vmem:[#allocation2 + $0x38] sm:$0xf0] }
  0x1a   :  { %387 = vmatpush.bf16.msrb.mxu3 %v836_v45  ;;  %v863_v39 = vor.u32 %v898_v37, %v862_v36  ;;  %v901_v45 = vld [vmem:[#allocation2 + $0x74] sm:$0xf0]  ;;  %v1120_v28 = vmov 32   ;;  %v1121_v29 = vmov 25   ;;  %v1124_v36 = vmov 29  }
  0x1b   :  { %462 = vmatpush.bf16.msrb.mxu0 %v845_v4  ;;  %vm205_vm4 = vcmask 523264   ;;  %vm207_vm5 = vcmask 785408  }
  0x1e   :  { %850 = vmatmul.msk.bf16.vlgmr.msrb.gmra.mxu0 %vm81_vm1, %v1183_v0 }
  0x1f   :  { %761 = vmatpush.bf16.msra.mxu0 %v885_v63 }
  0x87   :  { %v69_v6 = vpop.f32.mrf.mxu0 }
  0x88   :  { %811 = vmatmul.msk.f32.vlgmr.msra.gmra.mxu1 %vm81_vm1, %v69_v6  ;;  %v897_v6 = vld [vmem:[#allocation2 + $0x6c] sm:$0xf0] }
  0x89   :  { %v858_v8 = vor.u32 %v897_v6, %v857_v5  ;;  %611 = vmatpush.bf16.msra.mxu1 %v867_v31 }
  0x8d   :  { %612 = vmatpush.bf16.msra.mxu1 %v863_v39  ;;  %v1125_v39 = vmov 30  }
  0x8f   :  { %v71_v7 = vpop.f32.mrf.mxu0 }
  0x90   :  { %832 = vmatmul.msk.bf16.vlgmr.msrb.gmra.mxu1 %vm81_vm1, %v1183_v0 }
  0xa0   :  { %868 = vmatmul.msk.bf16.vlgmr.msra.gmra.mxu1 %vm81_vm1, %v1183_v0 }
 0x105   :  { %v102_v13 = vpop.f32.mrf.mxu1 }
 0x106   :  { %v103_v14 = vadd.f32 %v1006_v12, %v102_v13  ;;  %v853_v12 = vld [vmem:[#allocation2 + $0x10] sm:$0xf] }
 0x107   :  { %v896_v13 = vld [vmem:[#allocation2 + $0x2c] sm:$0xf0] }
 0x108   :  { %v105_v15 = vmax.f32 %v103_v14, 0.0  ;;  %v1103_v14 = vmov 4  }
 0x10a   :  { %812 = vmatmul.msk.f32.vlgmr.msra.gmra.mxu2 %vm56_vm0, %v105_v15  ;;  %v854_v15 = vor.u32 %v896_v13, %v853_v12  ;;  %v1116_v13 = vmov 20  }
 0x10b   :  { %536 = vmatpush.bf16.msra.mxu2 %v858_v8 }
 0x10f   :  { %537 = vmatpush.bf16.msra.mxu2 %v854_v15 }
 0x112   :  { %823 = vmatmul.msk.bf16.vlgmr.msrb.gmra.mxu2 %vm81_vm1, %v1183_v0 }
 0x122   :  { %859 = vmatmul.msk.bf16.vlgmr.msra.gmra.mxu2 %vm81_vm1, %v1183_v0 }
 0x18d   :  { %v132_v20 = vpop.f32.mrf.mxu2 }
 0x18e   :  { %v1231_v21 = vadd.f32 %v1007_v19, %v132_v20 }
 0x190   :  { %v135_v22 = vand.u32 2147483647, %v1231_v21 }
 0x192   :  { %814 = vmatmul.msk.f32.vlgmr.msra.gmra.mxu3 %vm141_vm3, %v135_v22  ;;  %v1105_v22 = vmov 5  }
 0x19a   :  { %841 = vmatmul.msk.bf16.vlgmr.msrb.gmra.mxu3 %vm81_vm1, %v1183_v0 }
 0x215   :  { %v166_v23 = vpop.f32.mrf.mxu3 }
 0x216   :  { %v167_v24 = vadd.f32 0.001, %v166_v23  ;;  %v1106_v23 = vmov 11  }
 0x218   :  { %1008 = vrcp.f32 %v167_v24 }
 0x21d   :  { %v389_v61 = vpop.f32.mrf.mxu3 }
 0x21e   :  { %v1234_v25 = vpop.eup %1008 }
 0x21f   :  { %195 = vrot.lane.b32.xlu2 %v1234_v25, %s1065_s15  ;;  %186 = vrot.lane.b32.xlu1 %v1234_v25, %s1066_s6  ;;  %v170_v35 = vmul.f32 %v1234_v25, %v1231_v21  ;;  %s1098_s15 = smov 27   ;;  %s1099_s6 = smov 30  }
 0x220   :  { %177 = vrot.lane.b32.xlu0 %v1234_v25, %s1067_s7  ;;  %s1128_s7 = smov 64  }
 0x227   :  { %275 = vrot.lane.b32.xlu2 %v1234_v25, %s1068_s5  ;;  %248 = vrot.lane.b32.xlu1 %v1234_v25, %s1069_s16  ;;  %s1129_s5 = smov [#allocation5]  }
 0x228   :  { %266 = vrot.lane.b32.xlu0 %v1234_v25, %s1070_s17  ;;  %s791_s16 = sshll.u32 %s1129_s5, 4  ;;  %s792_s16 = int_to_ptr.vmem [resolvable:$true] %s791_s16 }
 0x22f   :  { %350 = vrot.lane.b32.xlu2 %v1234_v25, %s1071_s18  ;;  %257 = vrot.lane.b32.xlu1 %v1234_v25, %s1072_s19  ;;  %s793_s19 = sshll.u32 %s1360_s8, 4  ;;  %s794_s19 = int_to_ptr.hbm [resolvable:$true] %s793_s19 }
 0x230   :  { %341 = vrot.lane.b32.xlu0 %v1234_v25, %s1073_s20  ;;  %s1130_s20 = smov 128  }
 0x237   :  { %473 = vrot.lane.b32.xlu2 %v1234_v25, %s1074_s0  ;;  %323 = vrot.lane.b32.xlu1 %v1234_v25, %s1075_s21 }
 0x238   :  { %416 = vrot.lane.b32.xlu0 %v1234_v25, %s1076_s1 }
 0x23f   :  { %500 = vrot.lane.b32.xlu2 %v1234_v25, %s1077_s22  ;;  %332 = vrot.lane.b32.xlu1 %v1234_v25, %s1078_s23 }
 0x240   :  { %482 = vrot.lane.b32.xlu0 %v1234_v25, %s1079_s24 }
 0x247   :  { %566 = vrot.lane.b32.xlu2 %v1234_v25, %s1081_s25  ;;  %398 = vrot.lane.b32.xlu1 %v1234_v25, %s1082_s26 }
 0x248   :  { %548 = vrot.lane.b32.xlu0 %v1234_v25, %s1083_s2 }
 0x24f   :  { %632 = vrot.lane.b32.xlu2 %v1234_v25, %s1084_s27  ;;  %407 = vrot.lane.b32.xlu1 %v1234_v25, %s1085_s28 }
 0x250   :  { %575 = vrot.lane.b32.xlu0 %v1234_v25, %s1086_s29 }
 0x257   :  { %698 = vrot.lane.b32.xlu2 %v1234_v25, %s1087_s4  ;;  %425 = vrot.lane.b32.xlu1 %v1234_v25, %s1088_s30 }
 0x258   :  { %641 = vrot.lane.b32.xlu0 %v1234_v25, %s1089_s9 }
 0x25f   :  { %725 = vrot.lane.b32.xlu2 %v1234_v25, %s1090_s10  ;;  %491 = vrot.lane.b32.xlu1 %v1234_v25, %s1091_s12 }
 0x260   :  { %707 = vrot.lane.b32.xlu0 %v1234_v25, %s1092_s13 }
 0x267   :  { %557 = vrot.lane.b32.xlu1 %v1234_v25, %s1093_s3 }
 0x268   :  { %173 = vperm.xlu0 %973, %v170_v35  }
 0x26f   :  { %623 = vrot.lane.b32.xlu1 %v1234_v25, %s1094_s14 }
 0x270   :  { %976 = vset.pattern.permute.xlu0 %v1095_v46  ;;  %v876_v46 = vor.u32 %v901_v45, %v875_v44 }
 0x272   :  { %686 = vmatpush.bf16.msra.mxu3 %v876_v46 }
 0x277   :  { %650 = vrot.lane.b32.xlu1 %v1234_v25, %s1098_s15 }
 0x279   :  { %v196_v49 = vpop.permute.xlu2 %195 }
 0x27a   :  { %v198_v50 = vmul.f32 %v196_v49, %v1231_v21 }
 0x27c   :  { %201 = vperm.xlu0 %976, %v198_v50   ;;  %v872_v50 = vor.u32 %v900_v48, %v871_v47  ;;  %v1127_v47 = vmov 33  }
 0x27e   :  { %687 = vmatpush.bf16.msra.mxu3 %v872_v50 }
 0x27f   :  { %716 = vrot.lane.b32.xlu1 %v1234_v25, %s1099_s6 }
 0x281   :  { %v276_v51 = vpop.permute.xlu2 %275  ;;  %877 = vmatmul.msk.bf16.vlgmr.msra.gmra.mxu3 %vm81_vm1, %v1183_v0 }
 0x282   :  { %v278_v52 = vmul.f32 %v276_v51, %v1231_v21 }
 0x284   :  { %980 = vset.pattern.permute.xlu0 %v1100_v53 }
 0x285   :  { %281 = vperm.xlu0 %980, %v278_v52   ;;  %v1111_v52 = vmov 13  }
 0x289   :  { %v351_v54 = vpop.permute.xlu2 %350 }
 0x28a   :  { %v353_v55 = vmul.f32 %v351_v54, %v1231_v21  ;;  %v1112_v54 = vmov 27  }
 0x28d   :  { %984 = vset.pattern.permute.xlu0 %v1101_v56 }
 0x28e   :  { %356 = vperm.xlu0 %984, %v353_v55  }
 0x291   :  { %v187_v57 = vpop.permute.xlu1 %186  ;;  %v1289_v24 = vpop.permute.xlu2 %473 }
 0x292   :  { %v189_v58 = vmul.f32 %v187_v57, %v1231_v21  ;;  %v178_v59 = vpop.permute.xlu0 %177  ;;  %v1113_v57 = vmov 14   ;;  %v476_v4 = vmul.f32 %v1289_v24, %v1231_v21  ;;  %v1119_v24 = vmov 24  }
 0x293   :  { %v180_v60 = vmul.f32 %v178_v59, %v1231_v21 }
 0x294   :  { %192 = vperm.xlu2 %975, %v189_v58  }
 0x295   :  { %183 = vperm.xlu1 %974, %v180_v60  }
 0x296   :  { %987 = vset.pattern.permute.xlu0 %v1102_v1  ;;  %v880_v1 = vld [vmem:[#allocation2 + $0x1c] sm:$0xf] }
 0x297   :  { %v881_v3 = vor.u32 %v902_v2, %v880_v1 }
 0x299   :  { %v249_v7 = vpop.permute.xlu1 %248  ;;  %v501_v34 = vpop.permute.xlu2 %500  ;;  %762 = vmatpush.bf16.msra.mxu0 %v881_v3 }
 0x29a   :  { %v251_v9 = vmul.f32 %v249_v7, %v1231_v21  ;;  %v267_v10 = vpop.permute.xlu0 %266  ;;  %v503_v38 = vmul.f32 %v501_v34, %v1231_v21  ;;  %v1114_v7 = vmov 18  }
 0x29b   :  { %v269_v11 = vmul.f32 %v267_v10, %v1231_v21  ;;  %v1115_v10 = vmov 19  }
 0x29c   :  { %977 = vset.pattern.permute.xlu2 %v1103_v14  ;;  %886 = vmatmul.msk.bf16.vlgmr.msra.gmra.mxu0 %vm81_vm1, %v1183_v0  ;;  %v1118_v0 = vmov 23  }
 0x29d   :  { %979 = vset.pattern.permute.xlu1 %v1104_v16  ;;  %254 = vperm.xlu2 %977, %v251_v9   ;;  %v1117_v16 = vmov 22  }
 0x29e   :  { %272 = vperm.xlu1 %979, %v269_v11  }
 0x2a1   :  { %v258_v17 = vpop.permute.xlu1 %257  ;;  %v567_v55 = vpop.permute.xlu2 %566 }
 0x2a2   :  { %v342_v18 = vpop.permute.xlu0 %341  ;;  %v260_v19 = vmul.f32 %v258_v17, %v1231_v21 }
 0x2a3   :  { %v344_v20 = vmul.f32 %v342_v18, %v1231_v21 }
 0x2a5   :  { %978 = vset.pattern.permute.xlu2 %v1105_v22  ;;  %v569_v22 = vmul.f32 %v567_v55, %v1231_v21 }
 0x2a6   :  { %983 = vset.pattern.permute.xlu1 %v1106_v23  ;;  %263 = vperm.xlu2 %978, %v260_v19  }
 0x2a7   :  { %347 = vperm.xlu1 %983, %v344_v20  }
 0x2a9   :  { %v324_v25 = vpop.permute.xlu1 %323  ;;  %v633_v6 = vpop.permute.xlu2 %632 }
 0x2aa   :  { %v417_v26 = vpop.permute.xlu0 %416  ;;  %v326_v30 = vmul.f32 %v324_v25, %v1231_v21 }
 0x2ab   :  { %v419_v27 = vmul.f32 %v417_v26, %v1231_v21 }
 0x2ad   :  { %422 = vperm.xlu0 %987, %v419_v27  }
 0x2ae   :  { %981 = vset.pattern.permute.xlu2 %v1107_v32  ;;  %v1122_v32 = vmov 28  }
 0x2af   :  { %329 = vperm.xlu2 %981, %v326_v30   ;;  %988 = vset.pattern.permute.xlu1 %v1108_v33  ;;  %v635_v30 = vmul.f32 %v633_v6, %v1231_v21 }
 0x2b1   :  { %v333_v35 = vpop.permute.xlu1 %332  ;;  %v699_v14 = vpop.permute.xlu2 %698 }
 0x2b2   :  { %v335_v41 = vmul.f32 %v333_v35, %v1231_v21  ;;  %v483_v51 = vpop.permute.xlu0 %482  ;;  %v1123_v35 = vmov 34  }
 0x2b3   :  { %v485_v8 = vmul.f32 %v483_v51, %v1231_v21  ;;  %v239_v51 = vpop.f32.mrf.mxu2 }
 0x2b5   :  { %992 = vset.pattern.permute.xlu0 %v1109_v40 }
 0x2b6   :  { %506 = vperm.xlu0 %992, %v503_v38  }
 0x2b7   :  { %982 = vset.pattern.permute.xlu2 %v1110_v42 }
 0x2b8   :  { %338 = vperm.xlu2 %982, %v335_v41   ;;  %v701_v41 = vmul.f32 %v699_v14, %v1231_v21 }
 0x2b9   :  { %v399_v43 = vpop.permute.xlu1 %398  ;;  %v726_v23 = vpop.permute.xlu2 %725 }
 0x2ba   :  { %v401_v49 = vmul.f32 %v399_v43, %v1231_v21  ;;  %v549_v59 = vpop.permute.xlu0 %548  ;;  %v1126_v43 = vmov 31  }
 0x2bb   :  { %v551_v15 = vmul.f32 %v549_v59, %v1231_v21  ;;  %v241_v62 = vpop.f32.mrf.mxu2 }
 0x2be   :  { %997 = vset.pattern.permute.xlu0 %v1112_v54 }
 0x2c0   :  { %985 = vset.pattern.permute.xlu2 %v1111_v52 }
 0x2c1   :  { %404 = vperm.xlu2 %985, %v401_v49   ;;  %v408_v53 = vpop.permute.xlu1 %407  ;;  %v728_v49 = vmul.f32 %v726_v23, %v1231_v21 }
 0x2c2   :  { %v410_v56 = vmul.f32 %v408_v53, %v1231_v21  ;;  %v576_v9 = vpop.permute.xlu0 %575  ;;  %v314_v53 = vpop.f32.mrf.mxu1 }
 0x2c3   :  { %v578_v27 = vmul.f32 %v576_v9, %v1231_v21 }
 0x2c9   :  { %986 = vset.pattern.permute.xlu2 %v1113_v57  ;;  %v426_v58 = vpop.permute.xlu1 %425 }
 0x2ca   :  { %v428_v60 = vmul.f32 %v426_v58, %v1231_v21  ;;  %413 = vperm.xlu2 %986, %v410_v56   ;;  %v642_v17 = vpop.permute.xlu0 %641  ;;  %v316_v1 = vpop.f32.mrf.mxu1 }
 0x2cb   :  { %v644_v34 = vmul.f32 %v642_v17, %v1231_v21 }
 0x2cc   :  { %431 = vperm.xlu1 %988, %v428_v60  }
 0x2d1   :  { %v492_v5 = vpop.permute.xlu1 %491 }
 0x2d2   :  { %989 = vset.pattern.permute.xlu2 %v1114_v7  ;;  %v494_v12 = vmul.f32 %v492_v5, %v1231_v21  ;;  %v708_v25 = vpop.permute.xlu0 %707 }
 0x2d3   :  { %479 = vperm.xlu2 %989, %v476_v4   ;;  %v710_v26 = vmul.f32 %v708_v25, %v1231_v21 }
 0x2d4   :  { %990 = vset.pattern.permute.xlu1 %v1115_v10 }
 0x2d5   :  { %488 = vperm.xlu1 %990, %v485_v8  }
 0x2d9   :  { %v558_v11 = vpop.permute.xlu1 %557 }
 0x2da   :  { %v560_v20 = vmul.f32 %v558_v11, %v1231_v21  ;;  %v174_v42 = vpop.permute.xlu0 %173 }
 0x2db   :  { %991 = vset.pattern.permute.xlu2 %v1116_v13 }
 0x2dc   :  { %497 = vperm.xlu2 %991, %v494_v12  }
 0x2dd   :  { %993 = vset.pattern.permute.xlu1 %v1117_v16  ;;  %v391_v16 = vpop.f32.mrf.mxu3 }
 0x2de   :  { %554 = vperm.xlu1 %993, %v551_v15  }
 0x2e1   :  { %v624_v18 = vpop.permute.xlu1 %623 }
 0x2e2   :  { %v626_v19 = vmul.f32 %v624_v18, %v1231_v21 }
 0x2e4   :  { %994 = vset.pattern.permute.xlu2 %v1118_v0  ;;  %629 = vperm.xlu0 %997, %v626_v19  }
 0x2e5   :  { %563 = vperm.xlu2 %994, %v560_v20  }
 0x2e6   :  { %995 = vset.pattern.permute.xlu1 %v1119_v24 }
 0x2e7   :  { %572 = vperm.xlu1 %995, %v569_v22  }
 0x2e9   :  { %v651_v33 = vpop.permute.xlu1 %650 }
 0x2ea   :  { %v653_v37 = vmul.f32 %v651_v33, %v1231_v21 }
 0x2ec   :  { %1002 = vset.pattern.permute.xlu0 %v1120_v28 }
 0x2ed   :  { %996 = vset.pattern.permute.xlu2 %v1121_v29  ;;  %713 = vperm.xlu0 %1002, %v710_v26  }
 0x2ee   :  { %v193_v31 = vpop.permute.xlu2 %192  ;;  %581 = vperm.xlu2 %996, %v578_v27   ;;  %v202_v48 = vpop.permute.xlu0 %201 }
 0x2ef   :  { %998 = vset.pattern.permute.xlu1 %v1122_v32 }
 0x2f0   :  { %638 = vperm.xlu1 %998, %v635_v30  }
 0x2f1   :  { %v717_v40 = vpop.permute.xlu1 %716 }
 0x2f2   :  { %v719_v44 = vmul.f32 %v717_v40, %v1231_v21 }
 0x2f5   :  { %1005 = vset.pattern.permute.xlu0 %v1123_v35 }
 0x2f6   :  { %999 = vset.pattern.permute.xlu2 %v1124_v36 }
 0x2f7   :  { %v255_v38 = vpop.permute.xlu2 %254  ;;  %647 = vperm.xlu2 %999, %v644_v34   ;;  %v282_v57 = vpop.permute.xlu0 %281 }
 0x2f8   :  { %1000 = vset.pattern.permute.xlu1 %v1125_v39  ;;  %v464_v34 = vpop.f32.mrf.mxu0 }
 0x2f9   :  { %656 = vperm.xlu1 %1000, %v653_v37  }
 0x2ff   :  { %1001 = vset.pattern.permute.xlu2 %v1126_v43 }
 0x300   :  { %v264_v45 = vpop.permute.xlu2 %263  ;;  %704 = vperm.xlu2 %1001, %v701_v41   ;;  %v357_v13 = vpop.permute.xlu0 %356 }
 0x301   :  { %v284_v46 = vsel %vm81_vm1, %v255_v38, %v264_v45  ;;  %1003 = vset.pattern.permute.xlu1 %v1127_v47  ;;  %v466_v40 = vpop.f32.mrf.mxu0  ;;  %v539_v41 = vpop.f32.mrf.mxu2 }
 0x302   :  { %722 = vperm.xlu1 %1003, %v719_v44   ;;  %v614_v44 = vpop.f32.mrf.mxu1 }
 0x307   :  { %v184_v50 = vpop.permute.xlu1 %183 }
 0x308   :  { %v204_v52 = vsel %vm81_vm1, %v174_v42, %v184_v50  ;;  %1004 = vset.pattern.permute.xlu2 %v1123_v35 }
 0x309   :  { %731 = vperm.xlu2 %1004, %v728_v49   ;;  %v206_v54 = vsel %vm205_vm4, %v204_v52, %v193_v31  ;;  %v330_v55 = vpop.permute.xlu2 %329 }
 0x30a   :  { %v208_v56 = vsel %vm207_vm5, %v206_v54, %v202_v48  ;;  %v689_v48 = vpop.f32.mrf.mxu3 }
 0x30b   :  { %v209_v59 = vperm.slane %v208_v56, 0  ;;  %v210_v60 = vperm.slane %v208_v56, 1 }
 0x30d   :  { %v244_v4 = vmul.f32 %v239_v51, %v209_v59  ;;  %v245_v5 = vmul.f32 %v241_v62, %v210_v60 }
 0x310   :  { %v273_v58 = vpop.permute.xlu1 %272 }
 0x311   :  { %v285_v21 = vsel %vm205_vm4, %v284_v46, %v273_v58 }
 0x312   :  { %v286_v63 = vsel %vm207_vm5, %v285_v21, %v282_v57  ;;  %v339_v8 = vpop.permute.xlu2 %338 }
 0x313   :  { %v287_v2 = vperm.slane %v286_v63, 0  ;;  %v288_v3 = vperm.slane %v286_v63, 1  ;;  %v359_v11 = vsel %vm81_vm1, %v330_v55, %v339_v8 }
 0x315   :  { %v319_v6 = vmul.f32 %v314_v53, %v287_v2  ;;  %v320_v7 = vmul.f32 %v316_v1, %v288_v3 }
 0x317   :  { %v321_v9 = vadd.f32 %v319_v6, %v244_v4  ;;  %v322_v10 = vadd.f32 %v320_v7, %v245_v5  ;;  %v616_v4 = vpop.f32.mrf.mxu1 }
 0x319   :  { %v348_v12 = vpop.permute.xlu1 %347  ;;  %v764_v58 = vpop.f32.mrf.mxu0 }
 0x31a   :  { %v360_v14 = vsel %vm205_vm4, %v359_v11, %v348_v12 }
 0x31b   :  { %v361_v15 = vsel %vm207_vm5, %v360_v14, %v357_v13  ;;  %v405_v23 = vpop.permute.xlu2 %404 }
 0x31c   :  { %v362_v17 = vperm.slane %v361_v15, 0  ;;  %v363_v18 = vperm.slane %v361_v15, 1 }
 0x31e   :  { %v394_v19 = vmul.f32 %v389_v61, %v362_v17  ;;  %v395_v20 = vmul.f32 %v391_v16, %v363_v18  ;;  %v541_v61 = vpop.f32.mrf.mxu2 }
 0x31f   :  { %v423_v31 = vpop.permute.xlu0 %422 }
 0x320   :  { %v396_v0 = vadd.f32 %v394_v19, %v321_v9  ;;  %v397_v22 = vadd.f32 %v395_v20, %v322_v10  ;;  %v691_v10 = vpop.f32.mrf.mxu3 }
 0x324   :  { %v414_v24 = vpop.permute.xlu2 %413 }
 0x325   :  { %v434_v38 = vsel %vm81_vm1, %v405_v23, %v414_v24 }
 0x326   :  { %v435_v42 = vsel %vm205_vm4, %v434_v38, %v423_v31 }
 0x328   :  { %v507_v35 = vpop.permute.xlu0 %506 }
 0x32d   :  { %v480_v25 = vpop.permute.xlu2 %479 }
 0x336   :  { %v498_v27 = vpop.permute.xlu2 %497 }
 0x33e   :  { %v432_v26 = vpop.permute.xlu1 %431 }
 0x33f   :  { %v564_v29 = vpop.permute.xlu2 %563  ;;  %v436_v45 = vsel %vm207_vm5, %v435_v42, %v432_v26 }
 0x340   :  { %v437_v51 = vperm.slane %v436_v45, 0  ;;  %v438_v53 = vperm.slane %v436_v45, 1 }
 0x342   :  { %v469_v21 = vmul.f32 %v464_v34, %v437_v51  ;;  %v470_v63 = vmul.f32 %v466_v40, %v438_v53 }
 0x344   :  { %v471_v9 = vadd.f32 %v469_v21, %v396_v0  ;;  %v472_v11 = vadd.f32 %v470_v63, %v397_v22 }
 0x347   :  { %v489_v28 = vpop.permute.xlu1 %488 }
 0x348   :  { %v582_v32 = vpop.permute.xlu2 %581  ;;  %v509_v39 = vsel %vm81_vm1, %v480_v25, %v489_v28  ;;  %v766_v25 = vpop.f32.mrf.mxu0 }
 0x349   :  { %v510_v43 = vsel %vm205_vm4, %v509_v39, %v498_v27 }
 0x34a   :  { %v511_v49 = vsel %vm207_vm5, %v510_v43, %v507_v35 }
 0x34b   :  { %v512_v56 = vperm.slane %v511_v49, 0  ;;  %v513_v59 = vperm.slane %v511_v49, 1 }
 0x34d   :  { %v544_v3 = vmul.f32 %v539_v41, %v512_v56  ;;  %v545_v5 = vmul.f32 %v541_v61, %v513_v59 }
 0x34f   :  { %v546_v14 = vadd.f32 %v544_v3, %v471_v9  ;;  %v547_v17 = vadd.f32 %v545_v5, %v472_v11 }
 0x350   :  { %v555_v30 = vpop.permute.xlu1 %554 }
 0x351   :  { %v648_v36 = vpop.permute.xlu2 %647  ;;  %v584_v47 = vsel %vm81_vm1, %v555_v30, %v564_v29 }
 0x356   :  { %v630_v46 = vpop.permute.xlu0 %629 }
 0x359   :  { %v573_v33 = vpop.permute.xlu1 %572 }
 0x35a   :  { %v585_v50 = vsel %vm205_vm4, %v584_v47, %v573_v33  ;;  %v705_v54 = vpop.permute.xlu2 %704 }
 0x35b   :  { %v586_v57 = vsel %vm207_vm5, %v585_v50, %v582_v32 }
 0x35c   :  { %v587_v1 = vperm.slane %v586_v57, 0  ;;  %v588_v2 = vperm.slane %v586_v57, 1 }
 0x35e   :  { %v619_v12 = vmul.f32 %v614_v44, %v587_v1  ;;  %v620_v13 = vmul.f32 %v616_v4, %v588_v2 }
 0x35f   :  { %v714_v6 = vpop.permute.xlu0 %713 }
 0x360   :  { %v734_v15 = vsel %vm81_vm1, %v705_v54, %v714_v6  ;;  %v622_v26 = vadd.f32 %v620_v13, %v547_v17  ;;  %v621_v28 = vadd.f32 %v619_v12, %v546_v14 }
 0x362   :  { %v639_v37 = vpop.permute.xlu1 %638 }
 0x363   :  { %v659_v52 = vsel %vm81_vm1, %v630_v46, %v639_v37  ;;  %v732_v18 = vpop.permute.xlu2 %731 }
 0x364   :  { %v660_v60 = vsel %vm205_vm4, %v659_v52, %v648_v36 }
 0x36b   :  { %v657_v55 = vpop.permute.xlu1 %656 }
 0x36c   :  { %v661_v62 = vsel %vm207_vm5, %v660_v60, %v657_v55 }
 0x36d   :  { %v662_v7 = vperm.slane %v661_v62, 0  ;;  %v663_v8 = vperm.slane %v661_v62, 1 }
 0x36f   :  { %v694_v19 = vmul.f32 %v689_v48, %v662_v7  ;;  %v695_v20 = vmul.f32 %v691_v10, %v663_v8 }
 0x371   :  { %v697_v22 = vadd.f32 %v695_v20, %v622_v26  ;;  %v696_v30 = vadd.f32 %v694_v19, %v621_v28 }
 0x374   :  { %v723_v16 = vpop.permute.xlu1 %722 }
 0x375   :  { %v735_v23 = vsel %vm205_vm4, %v734_v15, %v723_v16 }
 0x376   :  { %v736_v24 = vsel %vm207_vm5, %v735_v23, %v732_v18 }
 0x377   :  { %v737_v27 = vperm.slane %v736_v24, 0  ;;  %v738_v0 = vperm.slane %v736_v24, 1 }
 0x379   :  { %v770_v29 = vmul.f32 %v766_v25, %v738_v0  ;;  %v769_v31 = vmul.f32 %v764_v58, %v737_v27 }
 0x37b   :  { %v772_v32 = vadd.f32 %v770_v29, %v697_v22  ;;  %v771_v33 = vadd.f32 %v769_v31, %v696_v30 }
 0x37d   :  { %773 = vrot.lane.b32.xlu1 %v771_v33, %s1128_s7  ;;  %775 = vrot.lane.b32.xlu2 %v772_v32, %s1128_s7 }
 0x3d7   :  { %v776_v34 = vpop.permute.xlu2 %775 }
 0x3d8   :  { %v778_v35 = vadd.f32 %v776_v34, %v772_v32 }
 0x3da   :  { %781 = vrot.lane.b32.xlu1 %v778_v35, %s1064_s11 }
 0x3ef   :  { %v774_v36 = vpop.permute.xlu1 %773 }
 0x3f0   :  { %v777_v37 = vadd.f32 %v774_v36, %v771_v33 }
 0x3f2   :  { %779 = vrot.lane.b32.xlu0 %v777_v37, %s1064_s11 }
 0x44c   :  { %v782_v38 = vpop.permute.xlu1 %781 }
 0x44d   :  { %v784_v39 = vadd.f32 %v782_v38, %v778_v35 }
 0x44f   :  { %786 = vst.msk [vmem:[#allocation5 + $0x8] sm:$0xff] %vm81_vm1, %v784_v39 }
 0x464   :  { %v780_v40 = vpop.permute.xlu0 %779 }
 0x465   :  { %v783_v41 = vadd.f32 %v780_v40, %v777_v37 }
 0x467   :  { %785 = vst.msk [vmem:[#allocation5] sm:$0xff] %vm81_vm1, %v783_v41 }
 0x468   :  { %799 = dma.vmem_to_hbm [thread:$0]  %s792_s16, 256, %s794_s19, [#allocation4], %s1130_s20, %s1130_s20, %s1075_s21  }
 0x469   :  { %1060 = dma.done.wait [#allocation4], 256  }
 0x46a   :  { %1061 = vsyncadd [#allocation4], 4294967040 }
 0x46b   :  { %804 = vsyncpa [#allocation3], 1 }
 0x46c   :  { %805 = vsyncpa [#allocation4], 1 }

</bundles_post_ra>
